<compile_context>
chip_gen: v5e
topology: v5e:2x2
jax: 0.10.0
libtpu: 0.0.40
codegen_flags: <defaults>
</compile_context>

<pallas_src>
import jax
import jax.numpy as jnp
from jax.experimental import pallas as pl
from jax.experimental.pallas import tpu as pltpu


# ----------------------------------------------------------------------------
# Kernel
# ----------------------------------------------------------------------------
def _dma_copy_kernel(p_hbm_ref, o_hbm_ref, sem):
    # Single whole-tensor HBM->HBM DMA.  GridNet parameters are tiny
    # (3*gx*gy*gz floats, e.g. 64^3 grid ~ 3 MiB), so one DMA suffices;
    # chunking would only matter for multi-hundred-MiB tensors.
    cp = pltpu.make_async_copy(p_hbm_ref, o_hbm_ref, sem)
    cp.start()
    cp.wait()


# ----------------------------------------------------------------------------
# Wrappers
# ----------------------------------------------------------------------------
def gridnet_forward(params):
    """Pallas equivalent of GridNet.forward(): returns (a fresh copy of) the
    parameter tensor, moved with a single HBM->HBM DMA (no VMEM bounce)."""
    return pl.pallas_call(
        _dma_copy_kernel,
        out_shape=jax.ShapeDtypeStruct(params.shape, params.dtype),
        in_specs=[pl.BlockSpec(memory_space=pl.ANY)],
        out_specs=pl.BlockSpec(memory_space=pl.ANY),
        scratch_shapes=[pltpu.SemaphoreType.DMA],
    )(params)


def gridnet_forward_identity(params):
    """True zero-cost path: GridNet.forward() is literally `return self.params`.
    No kernel, no copy, no custom-call dispatch."""
    return params


def init_gridnet_params(key, grid_x, grid_y, grid_z):
    # Matches nn.Parameter(0.1 * torch.randn(1, 3, gx, gy, gz)) semantics.
    return 0.1 * jax.random.normal(
        key, (1, 3, grid_x, grid_y, grid_z), dtype=jnp.float32
    )


if __name__ == "__main__":
    key = jax.random.PRNGKey(0)

    # Small grid: (1, 3, 8, 8, 8).
    gx, gy, gz = 8, 8, 8
    params = init_gridnet_params(key, gx, gy, gz)

    # --- Pallas HBM->HBM DMA path ---
    out = jax.block_until_ready(gridnet_forward(params))
    assert out.shape == (1, 3, gx, gy, gz), out.shape
    assert out.dtype == jnp.float32, out.dtype
    assert bool(jnp.array_equal(out, params)), "DMA copy output != params"

    # --- true identity path (no kernel) ---
    out_id = jax.block_until_ready(gridnet_forward_identity(params))
    assert bool(jnp.array_equal(out_id, params)), "identity output != params"

    # --- larger grid to exercise a bigger single DMA ---
    params2 = init_gridnet_params(jax.random.PRNGKey(1), 16, 16, 16)
    out2 = jax.block_until_ready(gridnet_forward(params2))
    assert out2.shape == params2.shape
    assert bool(jnp.array_equal(out2, params2)), "DMA copy output != params (16^3)"

    print("KERNEL_OK")
</pallas_src>

<mosaic_0001>
module attributes {stable_mosaic.version = 11 : i64} {
  func.func @_dma_copy_kernel(%arg0: memref<1x3x8x8x8xf32, #tpu.memory_space<any>>, %arg1: memref<1x3x8x8x8xf32, #tpu.memory_space<any>>, %arg2: memref<!tpu.dma_semaphore, #tpu.memory_space<semaphore_mem>>) attributes {dimension_semantics = [], scalar_prefetch = 0 : i64, scratch_operands = 1 : i64, tpu.core_type = #tpu.core_type<tc>} {
    tpu.enqueue_dma source(%arg0 : memref<1x3x8x8x8xf32, #tpu.memory_space<any>>) target(%arg1 : memref<1x3x8x8x8xf32, #tpu.memory_space<any>>) target_semaphore(%arg2 : memref<!tpu.dma_semaphore, #tpu.memory_space<semaphore_mem>>)
    tpu.wait_dma2 semaphore(%arg2 : memref<!tpu.dma_semaphore, #tpu.memory_space<semaphore_mem>>) src(%arg0 : memref<1x3x8x8x8xf32, #tpu.memory_space<any>>) dst(%arg1 : memref<1x3x8x8x8xf32, #tpu.memory_space<any>>)
    return
  }
}

</mosaic_0001>

<bundles_post_ra>
// kernel: tpu_custom_call.1
= control target key start
LH: loop header
LB: loop body
LE: loop exit
PB: predicated region body
PF: predicated region fallthrough
CT: control target
= control target key end

     0   :  { %s35_s12 = smov [#allocation2]   ;;  %s36_s13 = smov [#allocation3]   ;;  %s54_s0 = inlined_call_operand.hbm [shape: f32[1,3,8,8,8], index: 0, kind: input, shape index: {}]   ;;  %s55_s1 = inlined_call_operand.hbm [shape: f32[1,3,8,8,8], index: 1, kind: output, shape index: {}]  }
   0x1   :  { %s10_s8 = sshll.u32 %s54_s0, 4  ;;  %s12_s11 = sshll.u32 %s55_s1, 4  ;;  %s11_s8 = int_to_ptr.hbm [resolvable:$true] %s10_s8  ;;  %s13_s11 = int_to_ptr.hbm [resolvable:$true] %s12_s11 }
   0x2   :  { %s37_s14 = smov 0  }
   0x3   :  { %16 = dma.general %s11_s8, 3072, %s13_s11, %s35_s12, %s36_s13, [#allocation4], %s37_s14, 0  }
   0x4   :  { %33 = dma.done.wait [#allocation2], 3072 }
   0x5   :  { %34 = vsyncadd [#allocation2], 4294964224 }
   0x6   :  { %23 = vsyncmov [#allocation2] }
   0x9   :  { %s24_s15 = vpop.sfrf %23 }
   0xa   :  { %p29_p0 = scmp.ne.s32.totalorder %s24_s15, 0 }
   0xc   :  { %28 = shalt.err (%p29_p0)  }

</bundles_post_ra>
